<compile_context>
chip_gen: v6e
topology: v6e:2x2x1
jax: 0.10.0
libtpu: 0.0.40
codegen_flags: <defaults>
</compile_context>

<pallas_src>
import functools

import jax
import jax.numpy as jnp
from jax.experimental import pallas as pl
from jax.experimental.pallas import tpu as pltpu


_LANE = 128      # lane width: feature-dim padding target (hidden/output dims)
_SUBLANE = 8     # sublane width: batch-tile granularity


def _round_up(n, m):
    return ((n + m - 1) // m) * m


def _cdiv(a, b):
    return -(-a // b)


# ----------------------------------------------------------------------------
# Kernel
# ----------------------------------------------------------------------------
def encoder_kernel(x_ref,
                   w0_ref, t0_ref,
                   w1_ref, t1_ref,
                   w2_ref, b2_ref,
                   o_ref):
    """Fused: [Linear(BN folded) + shift + ReLU] x2 -> Linear, one batch tile.

    Layer 0 runs in f32 (x and w0 are f32, true K = input_dim); layers 1 and 2
    use bf16 operands with f32 accumulation.  Dropout (eval) is identity.
    """
    # Block 0: Linear (BN scale folded into W) -> +shift -> ReLU
    h = jnp.dot(x_ref[...], w0_ref[...], preferred_element_type=jnp.float32)
    h = jnp.maximum(h + t0_ref[...], 0.0)

    # Block 1
    h = jnp.dot(h.astype(w1_ref.dtype), w1_ref[...],
                preferred_element_type=jnp.float32)
    h = jnp.maximum(h + t1_ref[...], 0.0)

    # Final plain Linear (no BN / activation); store bf16, lane-dense.
    h = jnp.dot(h.astype(w2_ref.dtype), w2_ref[...],
                preferred_element_type=jnp.float32)
    o_ref[...] = (h + b2_ref[...]).astype(o_ref.dtype)


# ----------------------------------------------------------------------------
# Wrapper
# ----------------------------------------------------------------------------
def _choose_tile_n(n):
    """Pick the batch tile size.

    * Small batches (<= 256 rows): one grid step (launch-latency bound).
    * Large batches: tiles of at most 1024 rows (>=85% of HBM roofline per
      measured tiled-add data), at least 2 grid steps so the "parallel" batch
      axis can shard across v7x's two TensorCores, and the batch is split as
      evenly as possible so tail-tile padding is at most a few rows.
    """
    n_eff = _round_up(n, _SUBLANE)
    if n_eff <= 256:
        return n_eff
    steps = max(2, _cdiv(n_eff, 1024))
    return _round_up(_cdiv(n_eff, steps), _SUBLANE)


def encoder_forward(x, kparams, d_out, *, tile_n=None):
    """x: [N, input_dim] float32. kparams: folded + padded kernel params."""
    N, d_in = x.shape
    w0, t0 = kparams["w0"], kparams["t0"]
    w1, t1 = kparams["w1"], kparams["t1"]
    w2, b2 = kparams["w2"], kparams["b2"]

    assert w0.shape[0] == d_in, "w0 must be stored at the model's true input_dim"
    d_out_pad = w2.shape[1]
    assert d_out <= d_out_pad

    if tile_n is None:
        tile_n = _choose_tile_n(N)
    num_tiles = _cdiv(N, tile_n)   # ragged last tile: OOB reads only feed rows
                                   # whose writes Pallas masks off.

    params = (w0, t0, w1, t1, w2, b2)
    flops = 2 * N * (w0.shape[0] * w0.shape[1]
                     + w1.shape[0] * w1.shape[1]
                     + w2.shape[0] * w2.shape[1])
    bytes_accessed = (x.size * x.dtype.itemsize
                      + sum(int(a.size) * a.dtype.itemsize for a in params)
                      + N * d_out_pad * 2)  # bf16 output writeback

    full = lambda a: pl.BlockSpec(a.shape, lambda i: (0, 0))  # VMEM-resident

    out = pl.pallas_call(
        encoder_kernel,
        out_shape=jax.ShapeDtypeStruct((N, d_out_pad), jnp.bfloat16),
        grid_spec=pl.GridSpec(
            grid=(num_tiles,),
            in_specs=[
                pl.BlockSpec((tile_n, d_in), lambda i: (i, 0)),   # x, true width
                full(w0), full(t0),
                full(w1), full(t1),
                full(w2), full(b2),
            ],
            out_specs=pl.BlockSpec((tile_n, d_out_pad), lambda i: (i, 0)),
        ),
        compiler_params=pltpu.CompilerParams(
            dimension_semantics=("parallel",),
        ),
        cost_estimate=pl.CostEstimate(
            flops=int(flops), transcendentals=0,
            bytes_accessed=int(bytes_accessed)),
    )(x, *params)

    # Tiny slice of padded output lanes + cast back to f32 (fuses under jit).
    return out[:, :d_out].astype(jnp.float32)


# ----------------------------------------------------------------------------
# Parameters: raw (PyTorch-like) init, then fold + pad for the kernel
# ----------------------------------------------------------------------------
def init_params(key, input_dim, layer_dims):
    """Raw parameters mirroring nn.Linear / nn.BatchNorm1d (eval-mode stats)."""
    dims = [input_dim] + list(layer_dims)
    layers = []
    keys = jax.random.split(key, len(layer_dims))
    for li in range(len(layer_dims)):
        d_in, d_out = dims[li], dims[li + 1]
        kw, kb, kg, kbeta, km, kv = jax.random.split(keys[li], 6)
        bound = 1.0 / jnp.sqrt(d_in)
        # Stored as [in, out] (transpose of PyTorch's [out, in]).
        layer = {
            "w": jax.random.uniform(kw, (d_in, d_out), jnp.float32, -bound, bound),
            "b": jax.random.uniform(kb, (d_out,), jnp.float32, -bound, bound),
        }
        if li < len(layer_dims) - 1:  # MLPBlock: has BatchNorm1d
            layer["gamma"] = 1.0 + 0.1 * jax.random.normal(kg, (d_out,), jnp.float32)
            layer["beta"] = 0.1 * jax.random.normal(kbeta, (d_out,), jnp.float32)
            layer["mean"] = 0.1 * jax.random.normal(km, (d_out,), jnp.float32)
            layer["var"] = 1.0 + 0.1 * jax.random.uniform(kv, (d_out,), jnp.float32)
        layers.append(layer)
    return layers


def fold_and_pad_params(layers, eps=1e-5, matmul_dtype=jnp.bfloat16):
    """Fold BN (eval) into the Linear and pad hidden/output feature dims to 128.

    y = BN(x @ W + b) = x @ (W * scale) + [beta + (b - mean) * scale]

    Layer 0 keeps its true K (= input_dim) and stays f32, so the kernel reads
    x unpadded/uncast.  Padded weight rows/cols and padded shifts are zero, so
    padded lanes stay exactly zero through ReLU and contribute nothing.
    """
    assert len(layers) == 3, "kernel is specialized to two MLPBlocks + final Linear"
    kp = {}
    for i, layer in enumerate(layers[:-1]):
        scale = layer["gamma"] / jnp.sqrt(layer["var"] + eps)
        w = layer["w"] * scale[None, :]
        shift = layer["beta"] + (layer["b"] - layer["mean"]) * scale
        d_in, d_o = w.shape
        d_in_p = d_in if i == 0 else _round_up(d_in, _LANE)   # layer 0: true K
        d_o_p = _round_up(d_o, _LANE)
        wp = jnp.zeros((d_in_p, d_o_p), jnp.float32).at[:d_in, :d_o].set(w)
        tp = jnp.zeros((1, d_o_p), jnp.float32).at[0, :d_o].set(shift)
        kp[f"w{i}"] = wp if i == 0 else wp.astype(matmul_dtype)  # layer 0: f32
        kp[f"t{i}"] = tp
    w, b = layers[-1]["w"], layers[-1]["b"]
    d_in, d_o = w.shape
    d_in_p, d_o_p = _round_up(d_in, _LANE), _round_up(d_o, _LANE)
    wp = jnp.zeros((d_in_p, d_o_p), jnp.float32).at[:d_in, :d_o].set(w)
    bp = jnp.zeros((1, d_o_p), jnp.float32).at[0, :d_o].set(b)
    kp["w2"] = wp.astype(matmul_dtype)
    kp["b2"] = bp
    return kp


# ----------------------------------------------------------------------------
# Reference (true eval-mode semantics, NOT using the folded params -> the
# allclose check independently validates the BN folding).
# ----------------------------------------------------------------------------
def reference_forward(x, layers, eps=1e-5):
    h = x
    for layer in layers[:-1]:
        h = h @ layer["w"] + layer["b"]
        h = (h - layer["mean"]) / jnp.sqrt(layer["var"] + eps)
        h = h * layer["gamma"] + layer["beta"]
        h = jnp.maximum(h, 0.0)
    return h @ layers[-1]["w"] + layers[-1]["b"]


if __name__ == "__main__":
    key = jax.random.PRNGKey(0)
    kx, kp = jax.random.split(key)

    N = 64                      # batch
    input_dim = 32
    layer_dims = [64, 48, 16]   # two MLPBlocks + final Linear
    d_out = layer_dims[-1]

    x = jax.random.normal(kx, (N, input_dim), jnp.float32)
    raw = init_params(kp, input_dim, layer_dims)
    kparams = fold_and_pad_params(raw)

    fwd = jax.jit(functools.partial(encoder_forward, d_out=d_out))
    out = fwd(x, kparams)
    out = jax.block_until_ready(out)

    ref = reference_forward(x, raw)
    assert out.shape == (N, d_out)
    # bf16 layers 1/2 + bf16 output -> loose tolerance vs the f32 un-folded ref.
    assert jnp.allclose(out, ref, atol=3e-2, rtol=3e-2), (
        float(jnp.max(jnp.abs(out - ref))))

    print("KERNEL_OK")
</pallas_src>

<mosaic_0001>
module attributes {stable_mosaic.version = 11 : i64} {
  func.func @encoder_kernel(%arg0: i32, %arg1: memref<64x32xf32, #tpu.memory_space<vmem>>, %arg2: memref<32x128xf32, #tpu.memory_space<vmem>>, %arg3: memref<1x128xf32, #tpu.memory_space<vmem>>, %arg4: memref<128x128xbf16, #tpu.memory_space<vmem>>, %arg5: memref<1x128xf32, #tpu.memory_space<vmem>>, %arg6: memref<128x128xbf16, #tpu.memory_space<vmem>>, %arg7: memref<1x128xf32, #tpu.memory_space<vmem>>, %arg8: memref<64x128xbf16, #tpu.memory_space<vmem>>) attributes {dimension_semantics = [#tpu.dimension_semantics<parallel>], iteration_bounds = array<i64: 1>, scalar_prefetch = 0 : i64, scratch_operands = 0 : i64, tpu.core_type = #tpu.core_type<tc>, window_params = [{transform_indices = @transform_0, window_bounds = array<i64: 64, 32>}, {pipeline_mode = #tpu.pipeline_mode<synchronous>, transform_indices = @transform_1, window_bounds = array<i64: 32, 128>}, {pipeline_mode = #tpu.pipeline_mode<synchronous>, transform_indices = @transform_2, window_bounds = array<i64: 1, 128>}, {pipeline_mode = #tpu.pipeline_mode<synchronous>, transform_indices = @transform_3, window_bounds = array<i64: 128, 128>}, {pipeline_mode = #tpu.pipeline_mode<synchronous>, transform_indices = @transform_4, window_bounds = array<i64: 1, 128>}, {pipeline_mode = #tpu.pipeline_mode<synchronous>, transform_indices = @transform_5, window_bounds = array<i64: 128, 128>}, {pipeline_mode = #tpu.pipeline_mode<synchronous>, transform_indices = @transform_6, window_bounds = array<i64: 1, 128>}, {transform_indices = @transform_7, window_bounds = array<i64: 64, 128>}]} {
    %c0 = arith.constant 0 : index
    %c0_0 = arith.constant 0 : index
    %0 = vector.load %arg1[%c0, %c0_0] : memref<64x32xf32, #tpu.memory_space<vmem>>, vector<64x32xf32>
    %c0_1 = arith.constant 0 : index
    %c0_2 = arith.constant 0 : index
    %1 = vector.load %arg2[%c0_1, %c0_2] : memref<32x128xf32, #tpu.memory_space<vmem>>, vector<32x128xf32>
    %cst = arith.constant dense<0.000000e+00> : vector<64x128xf32>
    %2 = tpu.matmul %0, %1, %cst {dimension_numbers = #tpu.dot_dimension_numbers<[1], [0], [0], [1], [0, 0, 1, 1], [], []>} : vector<64x32xf32>, vector<32x128xf32>, vector<64x128xf32> -> vector<64x128xf32>
    %c0_3 = arith.constant 0 : index
    %c0_4 = arith.constant 0 : index
    %3 = vector.load %arg3[%c0_3, %c0_4] : memref<1x128xf32, #tpu.memory_space<vmem>>, vector<1x128xf32>
    %4 = vector.broadcast %3 : vector<1x128xf32> to vector<64x128xf32>
    %5 = arith.addf %2, %4 : vector<64x128xf32>
    %cst_5 = arith.constant 0.000000e+00 : f32
    %6 = vector.broadcast %cst_5 : f32 to vector<64x128xf32>
    %7 = arith.maximumf %5, %6 : vector<64x128xf32>
    %8 = arith.truncf %7 : vector<64x128xf32> to vector<64x128xbf16>
    %c0_6 = arith.constant 0 : index
    %c0_7 = arith.constant 0 : index
    %9 = vector.load %arg4[%c0_6, %c0_7] : memref<128x128xbf16, #tpu.memory_space<vmem>>, vector<128x128xbf16>
    %cst_8 = arith.constant dense<0.000000e+00> : vector<64x128xf32>
    %10 = tpu.matmul %8, %9, %cst_8 {dimension_numbers = #tpu.dot_dimension_numbers<[1], [0], [0], [1], [0, 0, 1, 1], [], []>} : vector<64x128xbf16>, vector<128x128xbf16>, vector<64x128xf32> -> vector<64x128xf32>
    %c0_9 = arith.constant 0 : index
    %c0_10 = arith.constant 0 : index
    %11 = vector.load %arg5[%c0_9, %c0_10] : memref<1x128xf32, #tpu.memory_space<vmem>>, vector<1x128xf32>
    %12 = vector.broadcast %11 : vector<1x128xf32> to vector<64x128xf32>
    %13 = arith.addf %10, %12 : vector<64x128xf32>
    %cst_11 = arith.constant 0.000000e+00 : f32
    %14 = vector.broadcast %cst_11 : f32 to vector<64x128xf32>
    %15 = arith.maximumf %13, %14 : vector<64x128xf32>
    %16 = arith.truncf %15 : vector<64x128xf32> to vector<64x128xbf16>
    %c0_12 = arith.constant 0 : index
    %c0_13 = arith.constant 0 : index
    %17 = vector.load %arg6[%c0_12, %c0_13] : memref<128x128xbf16, #tpu.memory_space<vmem>>, vector<128x128xbf16>
    %cst_14 = arith.constant dense<0.000000e+00> : vector<64x128xf32>
    %18 = tpu.matmul %16, %17, %cst_14 {dimension_numbers = #tpu.dot_dimension_numbers<[1], [0], [0], [1], [0, 0, 1, 1], [], []>} : vector<64x128xbf16>, vector<128x128xbf16>, vector<64x128xf32> -> vector<64x128xf32>
    %c0_15 = arith.constant 0 : index
    %c0_16 = arith.constant 0 : index
    %19 = vector.load %arg7[%c0_15, %c0_16] : memref<1x128xf32, #tpu.memory_space<vmem>>, vector<1x128xf32>
    %20 = vector.broadcast %19 : vector<1x128xf32> to vector<64x128xf32>
    %21 = arith.addf %18, %20 : vector<64x128xf32>
    %22 = arith.truncf %21 : vector<64x128xf32> to vector<64x128xbf16>
    %c0_17 = arith.constant 0 : index
    %c0_18 = arith.constant 0 : index
    %23 = vector.load %arg8[%c0_17, %c0_18] : memref<64x128xbf16, #tpu.memory_space<vmem>>, vector<64x128xbf16>
    tpu.vector_store %arg8[%c0_17, %c0_18], %22 {strides = array<i32>} : memref<64x128xbf16, #tpu.memory_space<vmem>>, vector<64x128xbf16>,
    return
  }
  func.func @transform_0(%arg0: i32) -> (i32, i32) {
    %c0_i32 = arith.constant 0 : i32
    %c0_i32_0 = arith.constant 0 : i32
    return %arg0, %c0_i32 : i32, i32
  }
  func.func @transform_1(%arg0: i32) -> (i32, i32) {
    %c0_i32 = arith.constant 0 : i32
    %c0_i32_0 = arith.constant 0 : i32
    %c0_i32_1 = arith.constant 0 : i32
    return %c0_i32, %c0_i32_0 : i32, i32
  }
  func.func @transform_2(%arg0: i32) -> (i32, i32) {
    %c0_i32 = arith.constant 0 : i32
    %c0_i32_0 = arith.constant 0 : i32
    %c0_i32_1 = arith.constant 0 : i32
    return %c0_i32, %c0_i32_0 : i32, i32
  }
  func.func @transform_3(%arg0: i32) -> (i32, i32) {
    %c0_i32 = arith.constant 0 : i32
    %c0_i32_0 = arith.constant 0 : i32
    %c0_i32_1 = arith.constant 0 : i32
    return %c0_i32, %c0_i32_0 : i32, i32
  }
  func.func @transform_4(%arg0: i32) -> (i32, i32) {
    %c0_i32 = arith.constant 0 : i32
    %c0_i32_0 = arith.constant 0 : i32
    %c0_i32_1 = arith.constant 0 : i32
    return %c0_i32, %c0_i32_0 : i32, i32
  }
  func.func @transform_5(%arg0: i32) -> (i32, i32) {
    %c0_i32 = arith.constant 0 : i32
    %c0_i32_0 = arith.constant 0 : i32
    %c0_i32_1 = arith.constant 0 : i32
    return %c0_i32, %c0_i32_0 : i32, i32
  }
  func.func @transform_6(%arg0: i32) -> (i32, i32) {
    %c0_i32 = arith.constant 0 : i32
    %c0_i32_0 = arith.constant 0 : i32
    %c0_i32_1 = arith.constant 0 : i32
    return %c0_i32, %c0_i32_0 : i32, i32
  }
  func.func @transform_7(%arg0: i32) -> (i32, i32) {
    %c0_i32 = arith.constant 0 : i32
    %c0_i32_0 = arith.constant 0 : i32
    return %arg0, %c0_i32 : i32, i32
  }
}

</mosaic_0001>

<bundles_post_ra>
// kernel: encoder_forward.1
= control target key start
LH: loop header
LB: loop body
LE: loop exit
PB: predicated region body
PF: predicated region fallthrough
CT: control target
= control target key end

     0   :  { %12 = vsyncpa [#allocation3], 0  ;;  %s742_s24 = smov [#allocation2]   ;;  %s877_s0 = inlined_call_operand.vmem [shape: f32[64,32], index: 0, kind: input, shape index: {}]   ;;  %s878_s1 = inlined_call_operand.vmem [shape: f32[32,128], index: 1, kind: input, shape index: {}]   ;;  %s879_s2 = inlined_call_operand.vmem [shape: f32[1,128], index: 2, kind: input, shape index: {}]   ;;  %s880_s3 = inlined_call_operand.vmem [shape: bf16[128,128], index: 3, kind: input, shape index: {}]   ;;  %s881_s4 = inlined_call_operand.vmem [shape: f32[1,128], index: 4, kind: input, shape index: {}]   ;;  %s882_s5 = inlined_call_operand.hbm [shape: bf16[128,128], index: 5, kind: input, shape index: {}]   ;;  %s883_s6 = inlined_call_operand.vmem [shape: f32[1,128], index: 6, kind: input, shape index: {}]   ;;  %s884_s7 = inlined_call_operand.vmem [shape: bf16[64,128], index: 7, kind: output, shape index: {}]  }
   0x1   :  { %s28_s25 = sshll.u32 %s742_s24, 4  ;;  %s29_s25 = int_to_ptr.vmem [resolvable:$true] %s28_s25 }
   0x2   :  { %s728_s26 = scalar_lea.vmem %s29_s25, 1024  ;;  %p733_p1 = scmp.lt.s32.totalorder %s29_s25, %s29_s25 }
   0x3   :  { %p729_p0 = scmp.ne.s32.totalorder %s29_s25, %s728_s26  ;;  %p734_p2 = scmp.lt.s32.totalorder %s728_s26, %s728_s26 }
   0x5   :  { %p735_p3 = por %p734_p2, %p733_p1 }
   0x7   :  { %p736_p4 = pnand %p735_p3, %p729_p0 }
   0x9   :  { %739 = shalt.err (!%p736_p4)
}
   0xa   :  { %s743_s27 = smov 64   ;;  %s744_s28 = smov 4  }
   0xb   :  { %34 = dma.hbm_to_vmem [thread:$0]  %s882_s5, 1024, %s29_s25, [#allocation3], %s743_s27, %s743_s27, %s744_s28  }
   0xc   :  { %740 = dma.done.wait [#allocation3], 1024  }
   0xd   :  { %741 = vsyncadd [#allocation3], 4294966272  ;;  %vm60_vm0 = vcmask 261120   ;;  %v52_v0 = vld [vmem:[%s878_s1 + $0x18] sm:$0xff]  ;;  %v51_v1 = vld [vmem:[%s878_s1 + $0x10] sm:$0xff] }
   0xe   :  { %633 = vmatprep.subr.mxu0 %v52_v0  ;;  %v41_v2 = vld [vmem:[%s877_s0] sm:$0xff]  ;;  %v50_v3 = vld [vmem:[%s878_s1 + $0x8] sm:$0xff]  ;;  %v704_v5 = vld [vmem:[%s880_s3 + $0x38] sm:$0xff]  }
   0xf   :  { %634 = vmatpush3.msra.mxu0 %v52_v0  ;;  %641 = vmatprep.mubr.msk.f32.mxu0 %vm60_vm0, %v41_v2  ;;  %v49_v4 = vld [vmem:[%s878_s1] sm:$0xff]  ;;  %v705_v6 = vld [vmem:[%s880_s3 + $0x30] sm:$0xff]   ;;  %v42_v7 = vld [vmem:[%s877_s0 + $0x8] sm:$0xff] }
  0x10   :  { %635 = vmatprep.subr.mxu0 %v51_v1  ;;  %653 = vmatprep.subr.bf16.mxu1 %v704_v5  ;;  %v43_v8 = vld [vmem:[%s877_s0 + $0x10] sm:$0xff]  ;;  %v44_v9 = vld [vmem:[%s877_s0 + $0x18] sm:$0xff]  ;;  %v706_v10 = vld [vmem:[%s880_s3 + $0x28] sm:$0xff]  }
  0x11   :  { %636 = vmatpush3.msra.mxu0 %v51_v1  ;;  %654 = vmatpush3.bf16.msra.mxu1 %v704_v5  ;;  %v45_v11 = vld [vmem:[%s877_s0 + $0x20] sm:$0xff]  ;;  %v46_v13 = vld [vmem:[%s877_s0 + $0x28] sm:$0xff]  ;;  %v47_v14 = vld [vmem:[%s877_s0 + $0x30] sm:$0xff] }
  0x12   :  { %637 = vmatprep.subr.mxu0 %v50_v3  ;;  %655 = vmatprep.subr.bf16.mxu1 %v705_v6  ;;  %v707_v12 = vld [vmem:[%s880_s3 + $0x20] sm:$0xff]   ;;  %v708_v15 = vld [vmem:[%s880_s3 + $0x18] sm:$0xff]   ;;  %v709_v17 = vld [vmem:[%s880_s3 + $0x10] sm:$0xff]  }
  0x13   :  { %638 = vmatpush3.msra.mxu0 %v50_v3  ;;  %v48_v16 = vld [vmem:[%s877_s0 + $0x38] sm:$0xff]  ;;  %v710_v18 = vld [vmem:[%s880_s3 + $0x8] sm:$0xff]   ;;  %v711_v19 = vld [vmem:[%s880_s3] sm:$0xff]  }
  0x14   :  { %639 = vmatprep.subr.mxu0 %v49_v4  ;;  %v712_v20 = vld [vmem:[#allocation2 + $0x38] sm:$0xff]   ;;  %v713_v21 = vld [vmem:[#allocation2 + $0x30] sm:$0xff]   ;;  %v714_v22 = vld [vmem:[#allocation2 + $0x28] sm:$0xff]  }
  0x15   :  { %640 = vmatpush3.msra.mxu0 %v49_v4  ;;  %656 = vmatpush3.bf16.msra.mxu1 %v705_v6  ;;  %v715_v23 = vld [vmem:[#allocation2 + $0x20] sm:$0xff]   ;;  %v716_v24 = vld [vmem:[#allocation2 + $0x18] sm:$0xff]   ;;  %v717_v54 = vld [vmem:[#allocation2 + $0x10] sm:$0xff]  }
  0x16   :  { %642 = vmatmul.mubr.msk.f32.vlgmr.msra.gmra.mxu0 %vm60_vm0, %v42_v7  ;;  %657 = vmatprep.subr.bf16.mxu1 %v706_v10  ;;  %v531_v25 = vld [vmem:[%s879_s2] ss:$0 sm:$0xff]  ;;  %v718_v55 = vld [vmem:[#allocation2 + $0x8] sm:$0xff]  }
  0x17   :  { %644 = vmatprep.mubr.msk.f32.mxu0 %vm60_vm0, %v43_v8  ;;  %677 = vmatprep.subr.bf16.mxu0 %v712_v20  ;;  %v719_v56 = vld [vmem:[#allocation2] sm:$0xff]  }
  0x18   :  { %678 = vmatpush3.bf16.msra.mxu0 %v712_v20  ;;  %v540_v59 = vld [vmem:[%s881_s4] ss:$0 sm:$0xff] }
  0x19   :  { %658 = vmatpush3.bf16.msra.mxu1 %v706_v10  ;;  %679 = vmatprep.subr.bf16.mxu0 %v713_v21 }
  0x1a   :  { %645 = vmatmul.mubr.msk.f32.gmra.mxu0 %vm60_vm0, %v44_v9  ;;  %659 = vmatprep.subr.bf16.mxu1 %v707_v12 }
  0x1b   :  { %647 = vmatprep.mubr.msk.f32.mxu0 %vm60_vm0, %v45_v11 }
  0x1c   :  { %680 = vmatpush3.bf16.msra.mxu0 %v713_v21 }
  0x1d   :  { %660 = vmatpush3.bf16.msra.mxu1 %v707_v12  ;;  %681 = vmatprep.subr.bf16.mxu0 %v714_v22 }
  0x1e   :  { %648 = vmatmul.mubr.msk.f32.gmra.mxu0 %vm60_vm0, %v46_v13  ;;  %661 = vmatprep.subr.bf16.mxu1 %v708_v15 }
  0x1f   :  { %650 = vmatprep.mubr.msk.f32.mxu0 %vm60_vm0, %v47_v14 }
  0x20   :  { %682 = vmatpush3.bf16.msra.mxu0 %v714_v22 }
  0x21   :  { %662 = vmatpush3.bf16.msra.mxu1 %v708_v15  ;;  %683 = vmatprep.subr.bf16.mxu0 %v715_v23 }
  0x22   :  { %651 = vmatmul.mubr.msk.f32.gmra.mxu0 %vm60_vm0, %v48_v16  ;;  %663 = vmatprep.subr.bf16.mxu1 %v709_v17 }
  0x24   :  { %684 = vmatpush3.bf16.msra.mxu0 %v715_v23  ;;  %v549_v23 = vld [vmem:[%s883_s6] ss:$0 sm:$0xff] }
  0x25   :  { %664 = vmatpush3.bf16.msra.mxu1 %v709_v17  ;;  %685 = vmatprep.subr.bf16.mxu0 %v716_v24 }
  0x26   :  { %665 = vmatprep.subr.bf16.mxu1 %v710_v18 }
  0x28   :  { %686 = vmatpush3.bf16.msra.mxu0 %v716_v24 }
  0x29   :  { %666 = vmatpush3.bf16.msra.mxu1 %v710_v18  ;;  %687 = vmatprep.subr.bf16.mxu0 %v717_v54 }
  0x2a   :  { %667 = vmatprep.subr.bf16.mxu1 %v711_v19 }
  0x2c   :  { %688 = vmatpush3.bf16.msra.mxu0 %v717_v54 }
  0x2d   :  { %668 = vmatpush3.bf16.msra.mxu1 %v711_v19  ;;  %689 = vmatprep.subr.bf16.mxu0 %v718_v55 }
  0x30   :  { %690 = vmatpush3.bf16.msra.mxu0 %v718_v55 }
  0x31   :  { %691 = vmatprep.subr.bf16.mxu0 %v719_v56 }
  0x34   :  { %692 = vmatpush3.bf16.msra.mxu0 %v719_v56 }
  0xd6   :  { %v643_v26 = vpop.f32.mrf.mxu0 }
  0xd7   :  { %v157_v27 = vadd.f32 %v643_v26, %v531_v25 }
  0xd8   :  { %v151_v28 = vpop.f32.mrf.mxu0 }
  0xd9   :  { %v152_v29 = vadd.f32 %v531_v25, %v151_v28  ;;  %v191_v31 = vmax.f32 %v157_v27, 0.0 }
  0xda   :  { %v646_v30 = vpop.f32.mrf.mxu0 }
  0xdb   :  { %v190_v32 = vmax.f32 %v152_v29, 0.0  ;;  %v167_v33 = vadd.f32 %v646_v30, %v531_v25 }
  0xdc   :  { %v161_v34 = vpop.f32.mrf.mxu0 }
  0xdd   :  { %v162_v35 = vadd.f32 %v531_v25, %v161_v34  ;;  %v198_v36 = vpack.c.bf16 %v191_v31, %v190_v32  ;;  %v193_v38 = vmax.f32 %v167_v33, 0.0 }
  0xde   :  { %v649_v37 = vpop.f32.mrf.mxu0 }
  0xdf   :  { %v192_v39 = vmax.f32 %v162_v35, 0.0  ;;  %v177_v40 = vadd.f32 %v649_v37, %v531_v25  ;;  %669 = vmatprep.mubr.bf16.mxu1 %v198_v36 }
  0xe0   :  { %v171_v41 = vpop.f32.mrf.mxu0 }
  0xe1   :  { %v199_v42 = vpack.c.bf16 %v193_v38, %v192_v39  ;;  %v172_v43 = vadd.f32 %v531_v25, %v171_v41  ;;  %v195_v45 = vmax.f32 %v177_v40, 0.0 }
  0xe2   :  { %v652_v44 = vpop.f32.mrf.mxu0 }
  0xe3   :  { %v194_v46 = vmax.f32 %v172_v43, 0.0  ;;  %v187_v47 = vadd.f32 %v652_v44, %v531_v25  ;;  %670 = vmatmul.mubr.bf16.vlgmr.msra.gmra.mxu1 %v199_v42 }
  0xe4   :  { %v181_v48 = vpop.f32.mrf.mxu0 }
  0xe5   :  { %v200_v49 = vpack.c.bf16 %v195_v45, %v194_v46  ;;  %v182_v50 = vadd.f32 %v531_v25, %v181_v48  ;;  %v197_v51 = vmax.f32 %v187_v47, 0.0 }
  0xe7   :  { %v196_v52 = vmax.f32 %v182_v50, 0.0  ;;  %673 = vmatprep.mubr.bf16.mxu1 %v200_v49 }
  0xe9   :  { %v201_v53 = vpack.c.bf16 %v197_v51, %v196_v52 }
  0xeb   :  { %674 = vmatmul.mubr.bf16.gmra.mxu1 %v201_v53 }
 0x1a3   :  { %v671_v57 = vpop.f32.mrf.mxu1 }
 0x1a4   :  { %v316_v63 = vadd.f32 %v671_v57, %v540_v59 }
 0x1a5   :  { %v307_v58 = vpop.f32.mrf.mxu1 }
 0x1a6   :  { %v308_v61 = vadd.f32 %v540_v59, %v307_v58  ;;  %v340_v6 = vmax.f32 %v316_v63, 0.0 }
 0x1a7   :  { %v672_v60 = vpop.f32.mrf.mxu1 }
 0x1a8   :  { %v319_v62 = vadd.f32 %v672_v60, %v540_v59  ;;  %v338_v4 = vmax.f32 %v308_v61, 0.0 }
 0x1a9   :  { %v310_v0 = vpop.f32.mrf.mxu1 }
 0x1aa   :  { %v311_v1 = vadd.f32 %v540_v59, %v310_v0  ;;  %v341_v2 = vmax.f32 %v319_v62, 0.0 }
 0x1ab   :  { %v675_v3 = vpop.f32.mrf.mxu1 }
 0x1ac   :  { %v339_v5 = vmax.f32 %v311_v1, 0.0  ;;  %v347_v9 = vpack.c.bf16 %v341_v2, %v340_v6  ;;  %v332_v13 = vadd.f32 %v675_v3, %v540_v59 }
 0x1ad   :  { %v323_v7 = vpop.f32.mrf.mxu1 }
 0x1ae   :  { %v346_v8 = vpack.c.bf16 %v339_v5, %v338_v4  ;;  %v324_v11 = vadd.f32 %v540_v59, %v323_v7  ;;  %v344_v19 = vmax.f32 %v332_v13, 0.0 }
 0x1af   :  { %v676_v10 = vpop.f32.mrf.mxu1 }
 0x1b0   :  { %v335_v12 = vadd.f32 %v676_v10, %v540_v59  ;;  %693 = vmatprep.mubr.bf16.mxu0 %v346_v8  ;;  %v342_v17 = vmax.f32 %v324_v11, 0.0 }
 0x1b1   :  { %v326_v14 = vpop.f32.mrf.mxu1  ;;  %694 = vmatmul.mubr.bf16.vlgmr.msra.gmra.mxu0 %v347_v9 }
 0x1b2   :  { %v327_v15 = vadd.f32 %v540_v59, %v326_v14  ;;  %v345_v16 = vmax.f32 %v335_v12, 0.0 }
 0x1b4   :  { %v343_v18 = vmax.f32 %v327_v15, 0.0  ;;  %v349_v21 = vpack.c.bf16 %v345_v16, %v344_v19 }
 0x1b6   :  { %v348_v20 = vpack.c.bf16 %v343_v18, %v342_v17 }
 0x1b8   :  { %697 = vmatprep.mubr.bf16.mxu0 %v348_v20 }
 0x1b9   :  { %698 = vmatmul.mubr.bf16.gmra.mxu0 %v349_v21 }
 0x271   :  { %v695_v22 = vpop.f32.mrf.mxu0 }
 0x272   :  { %v464_v26 = vadd.f32 %v695_v22, %v549_v23 }
 0x273   :  { %v455_v24 = vpop.f32.mrf.mxu0 }
 0x274   :  { %v456_v29 = vadd.f32 %v549_v23, %v455_v24 }
 0x275   :  { %v696_v25 = vpop.f32.mrf.mxu0 }
 0x276   :  { %v467_v27 = vadd.f32 %v696_v25, %v549_v23 }
 0x277   :  { %v458_v28 = vpop.f32.mrf.mxu0 }
 0x278   :  { %v582_v30 = vpack.c.bf16 %v467_v27, %v464_v26  ;;  %v459_v31 = vadd.f32 %v549_v23, %v458_v28 }
 0x279   :  { %v699_v32 = vpop.f32.mrf.mxu0 }
 0x27a   :  { %594 = vst [vmem:[%s884_s7 + $0x8] sm:$0xff] %v582_v30   ;;  %v577_v33 = vpack.c.bf16 %v459_v31, %v456_v29  ;;  %v480_v36 = vadd.f32 %v699_v32, %v549_v23 }
 0x27b   :  { %v471_v34 = vpop.f32.mrf.mxu0 }
 0x27c   :  { %578 = vst [vmem:[%s884_s7] sm:$0xff] %v577_v33   ;;  %v472_v39 = vadd.f32 %v549_v23, %v471_v34 }
 0x27d   :  { %v700_v35 = vpop.f32.mrf.mxu0 }
 0x27e   :  { %v483_v37 = vadd.f32 %v700_v35, %v549_v23 }
 0x27f   :  { %v474_v38 = vpop.f32.mrf.mxu0 }
 0x280   :  { %v592_v40 = vpack.c.bf16 %v483_v37, %v480_v36  ;;  %v475_v41 = vadd.f32 %v549_v23, %v474_v38 }
 0x282   :  { %596 = vst [vmem:[%s884_s7 + $0x18] sm:$0xff] %v592_v40   ;;  %v587_v42 = vpack.c.bf16 %v475_v41, %v472_v39 }
 0x284   :  { %595 = vst [vmem:[%s884_s7 + $0x10] sm:$0xff] %v587_v42  }
 0x285   :  { %530 = vsyncpa [#allocation3], 1 }

</bundles_post_ra>
